<compile_context>
chip_gen: v5e
topology: v5e:2x2
jax: 0.10.0
libtpu: 0.0.40
codegen_flags: <defaults>
</compile_context>

<pallas_src>
import jax
import jax.numpy as jnp
from jax.experimental import pallas as pl
from jax.experimental.pallas import tpu as pltpu

_LANE = 128      # lane width: keep all feature dims lane-dense
_SUBLANE = 16    # bf16 sublane packing: batch tiles are multiples of 16


def _round_up(x, m):
    return (x + m - 1) // m * m


def _cdiv(a, b):
    return -(-a // b)


def bcnet_kernel(x_ref, w1_ref, b1_ref, w2_ref, b2_ref, w3_ref, b3_ref, o_ref):
    # x arrives as bf16 (MXU-native). Accumulate in f32; bias + ReLU on the
    # VPU in f32 (v5e has no bf16 VPU).
    h1 = jnp.dot(x_ref[...], w1_ref[...], preferred_element_type=jnp.float32)
    h1 = jnp.maximum(h1 + b1_ref[...], 0.0)

    h2 = jnp.dot(h1.astype(jnp.bfloat16), w2_ref[...],
                 preferred_element_type=jnp.float32)
    h2 = jnp.maximum(h2 + b2_ref[...], 0.0)

    out = jnp.dot(h2.astype(jnp.bfloat16), w3_ref[...],
                  preferred_element_type=jnp.float32)
    o_ref[...] = (out + b3_ref[...]).astype(o_ref.dtype)


def _weight_vmem_bytes(in_sz, h1_p, h2_p, out_p):
    # bf16 weights + f32 biases; assume double-buffered (conservative -- the
    # constant index_maps mean they are only fetched once in practice).
    w = 2 * 2 * (in_sz * h1_p + h1_p * h2_p + h2_p * out_p)
    b = 2 * 4 * (h1_p + h2_p + out_p)
    return w + b


def _per_row_vmem_bytes(in_sz, h1_p, h2_p, out_p, out_itemsize):
    x = 2 * in_sz * 2                  # bf16 x, double-buffered
    o = 2 * out_p * out_itemsize       # output, double-buffered
    act = (h1_p + h2_p) * 6            # f32 intermediates + bf16 copies
    return x + o + act


def prepare_bcnet_params(params):
    """Pad (to lane-dense multiples of 128) and cast weights to bf16 ONCE.

    Call this outside the per-forward path; the returned dict is what
    bcnet_forward consumes.  Only W *columns* (and W2/W3 rows, to match the
    padded activations) are zero-padded -- W1 rows stay at input_size so x can
    be fed unpadded.  Zero padding keeps the math exact.
    """
    w1, b1 = params["w1"], params["b1"]
    w2, b2 = params["w2"], params["b2"]
    w3, b3 = params["w3"], params["b3"]
    in_sz, h1_sz = w1.shape
    h2_sz = w2.shape[1]
    out_sz = w3.shape[1]
    h1_p = _round_up(h1_sz, _LANE)
    h2_p = _round_up(h2_sz, _LANE)
    out_p = _round_up(out_sz, _LANE)
    return {
        "w1": jnp.pad(w1, ((0, 0), (0, h1_p - h1_sz))).astype(jnp.bfloat16),
        "w2": jnp.pad(w2, ((0, h1_p - h1_sz), (0, h2_p - h2_sz))).astype(jnp.bfloat16),
        "w3": jnp.pad(w3, ((0, h2_p - h2_sz), (0, out_p - out_sz))).astype(jnp.bfloat16),
        "b1": jnp.pad(b1, (0, h1_p - h1_sz)).reshape(1, h1_p).astype(jnp.float32),
        "b2": jnp.pad(b2, (0, h2_p - h2_sz)).reshape(1, h2_p).astype(jnp.float32),
        "b3": jnp.pad(b3, (0, out_p - out_sz)).reshape(1, out_p).astype(jnp.float32),
        "out_size": out_sz,   # static python int (true, unpadded output width)
        "in_size": in_sz,     # static python int
    }


def bcnet_forward(x, prepared, *, batch_tile=None, out_dtype=jnp.float32):
    """x: (B, input_size), any float dtype. prepared: from prepare_bcnet_params."""
    B, in_sz = x.shape
    w1, w2, w3 = prepared["w1"], prepared["w2"], prepared["w3"]
    b1, b2, b3 = prepared["b1"], prepared["b2"], prepared["b3"]
    out_sz = prepared["out_size"]
    assert prepared["in_size"] == in_sz, (prepared["in_size"], in_sz)
    h1_p, h2_p, out_p = w1.shape[1], w2.shape[1], w3.shape[1]
    out_itemsize = jnp.dtype(out_dtype).itemsize

    # ---- Generation-aware VMEM budget (v5e/v6e: 128 MiB phys, v7x: 64 MiB). ----
    try:
        phys_vmem = int(pltpu.get_tpu_info().vmem_capacity_bytes)
    except Exception:
        phys_vmem = 64 * 1024 * 1024   # conservative fallback (v7x-safe)
    budget = (phys_vmem * 3) // 4

    w_bytes = _weight_vmem_bytes(in_sz, h1_p, h2_p, out_p)
    row_bytes = _per_row_vmem_bytes(in_sz, h1_p, h2_p, out_p, out_itemsize)
    if w_bytes + _SUBLANE * row_bytes > budget:
        # TODO(synk): add a feature-dim (K/N) grid axis so weights larger than
        # VMEM can stream instead of staying resident.
        raise NotImplementedError(
            "BCNet weights do not fit the resident-weight VMEM budget: "
            f"{w_bytes + _SUBLANE * row_bytes} > {budget} bytes")

    max_tile = max(_SUBLANE,
                   ((budget - w_bytes) // row_bytes) // _SUBLANE * _SUBLANE)

    # ---- Batch tiling: balanced tiles, >=2 steps when possible (v7x megacore),
    #      large cap (amortizes ~0.35 us/grid-step overhead), VMEM-checked. ----
    B_pad0 = _round_up(B, _SUBLANE)
    if batch_tile is None:
        cap = min(2048, max_tile)
        num_steps = max(_cdiv(B_pad0, cap), 2)
        batch_tile = _round_up(_cdiv(B_pad0, num_steps), _SUBLANE)
    else:
        batch_tile = _round_up(batch_tile, _SUBLANE)
    batch_tile = min(batch_tile, max_tile)
    grid_steps = _cdiv(B_pad0, batch_tile)
    B_pad = grid_steps * batch_tile

    # x fed as bf16 (halves x HBM traffic); feature dim unpadded (block dim
    # equals the full array dim, MXU handles K < 128). Only pad the batch dim
    # when it is not a tile multiple.
    x_p = x.astype(jnp.bfloat16)
    if B_pad != B:
        x_p = jnp.pad(x_p, ((0, B_pad - B), (0, 0)))

    vmem_est = w_bytes + batch_tile * row_bytes
    vmem_limit = int(max(32 * 1024 * 1024, min(budget, 2 * vmem_est)))

    flops = 2 * B_pad * (in_sz * h1_p + h1_p * h2_p + h2_p * out_p)
    bytes_accessed = int(x_p.size * 2
                         + (w1.size + w2.size + w3.size) * 2
                         + (b1.size + b2.size + b3.size) * 4
                         + B_pad * out_p * out_itemsize)

    out_padded = pl.pallas_call(
        bcnet_kernel,
        out_shape=jax.ShapeDtypeStruct((B_pad, out_p), out_dtype),
        grid_spec=pltpu.PrefetchScalarGridSpec(
            num_scalar_prefetch=0,
            grid=(grid_steps,),
            in_specs=[
                pl.BlockSpec((batch_tile, in_sz), lambda i: (i, 0)),  # x tile (bf16)
                pl.BlockSpec((in_sz, h1_p), lambda i: (0, 0)),        # w1 (resident)
                pl.BlockSpec((1, h1_p), lambda i: (0, 0)),            # b1
                pl.BlockSpec((h1_p, h2_p), lambda i: (0, 0)),         # w2
                pl.BlockSpec((1, h2_p), lambda i: (0, 0)),            # b2
                pl.BlockSpec((h2_p, out_p), lambda i: (0, 0)),        # w3
                pl.BlockSpec((1, out_p), lambda i: (0, 0)),           # b3
            ],
            out_specs=pl.BlockSpec((batch_tile, out_p), lambda i: (i, 0)),
        ),
        compiler_params=pltpu.CompilerParams(
            dimension_semantics=("parallel",),
            vmem_limit_bytes=vmem_limit,
        ),
        cost_estimate=pl.CostEstimate(
            flops=flops, transcendentals=0, bytes_accessed=bytes_accessed),
    )(x_p, w1, b1, w2, b2, w3, b3)

    # Slice off batch and lane padding.
    return out_padded[:B, :out_sz]


def init_bcnet_params(key, input_size, num_units_1, num_units_2, output_size):
    """Mirror the torch module: weights ~ N(0,1); biases keep torch's default
    Linear init U(-1/sqrt(fan_in), +1/sqrt(fan_in))."""
    ks = jax.random.split(key, 6)
    w1 = jax.random.normal(ks[0], (input_size, num_units_1), jnp.float32)
    w2 = jax.random.normal(ks[1], (num_units_1, num_units_2), jnp.float32)
    w3 = jax.random.normal(ks[2], (num_units_2, output_size), jnp.float32)
    b1 = jax.random.uniform(ks[3], (num_units_1,), jnp.float32,
                            -1.0 / jnp.sqrt(input_size), 1.0 / jnp.sqrt(input_size))
    b2 = jax.random.uniform(ks[4], (num_units_2,), jnp.float32,
                            -1.0 / jnp.sqrt(num_units_1), 1.0 / jnp.sqrt(num_units_1))
    b3 = jax.random.uniform(ks[5], (output_size,), jnp.float32,
                            -1.0 / jnp.sqrt(num_units_2), 1.0 / jnp.sqrt(num_units_2))
    return {"w1": w1, "b1": b1, "w2": w2, "b2": b2, "w3": w3, "b3": b3}


def bcnet_ref(x, p):
    h1 = jnp.maximum(x @ p["w1"] + p["b1"], 0.0)
    h2 = jnp.maximum(h1 @ p["w2"] + p["b2"], 0.0)
    return h2 @ p["w3"] + p["b3"]


if __name__ == "__main__":
    # Small shapes consistent with the module's forward:
    # batch=8, input_size=32, num_units_1=64, num_units_2=64, output_size=16
    # NOTE: bf16 matmul inputs intentionally trade ~1e-2-level relative error
    # for MXU throughput; callers needing f32-exact Linear layers should use
    # plain jitted XLA (bcnet_ref).
    B, INPUT, H1, H2, OUT = 8, 32, 64, 64, 16

    key = jax.random.PRNGKey(0)
    k_params, k_x = jax.random.split(key)
    params = init_bcnet_params(k_params, INPUT, H1, H2, OUT)
    x = jax.random.normal(k_x, (B, INPUT), jnp.float32)

    prepared = prepare_bcnet_params(params)   # pad + cast weights ONCE
    out = bcnet_forward(x, prepared)
    out = jax.block_until_ready(out)

    ref = bcnet_ref(x, params)
    assert out.shape == (B, OUT), out.shape
    # bf16 matmul inputs (f32 accumulation) => compare with a bf16-level tolerance.
    err = float(jnp.max(jnp.abs(out - ref)))
    scale = float(jnp.max(jnp.abs(ref))) + 1e-6
    assert err / scale < 3e-2, f"mismatch vs reference: rel err {err / scale:.4f}"

    print("KERNEL_OK")
</pallas_src>

<mosaic_0001>
module attributes {stable_mosaic.version = 11 : i64} {
  func.func @bcnet_kernel(%arg0: i32, %arg1: memref<16x32xbf16, #tpu.memory_space<vmem>>, %arg2: memref<32x128xbf16, #tpu.memory_space<vmem>>, %arg3: memref<1x128xf32, #tpu.memory_space<vmem>>, %arg4: memref<128x128xbf16, #tpu.memory_space<vmem>>, %arg5: memref<1x128xf32, #tpu.memory_space<vmem>>, %arg6: memref<128x128xbf16, #tpu.memory_space<vmem>>, %arg7: memref<1x128xf32, #tpu.memory_space<vmem>>, %arg8: memref<16x128xf32, #tpu.memory_space<vmem>>) attributes {dimension_semantics = [#tpu.dimension_semantics<parallel>], iteration_bounds = array<i64: 1>, scalar_prefetch = 0 : i64, scratch_operands = 0 : i64, tpu.core_type = #tpu.core_type<tc>, window_params = [{transform_indices = @transform_0, window_bounds = array<i64: 16, 32>}, {pipeline_mode = #tpu.pipeline_mode<synchronous>, transform_indices = @transform_1, window_bounds = array<i64: 32, 128>}, {pipeline_mode = #tpu.pipeline_mode<synchronous>, transform_indices = @transform_2, window_bounds = array<i64: 1, 128>}, {pipeline_mode = #tpu.pipeline_mode<synchronous>, transform_indices = @transform_3, window_bounds = array<i64: 128, 128>}, {pipeline_mode = #tpu.pipeline_mode<synchronous>, transform_indices = @transform_4, window_bounds = array<i64: 1, 128>}, {pipeline_mode = #tpu.pipeline_mode<synchronous>, transform_indices = @transform_5, window_bounds = array<i64: 128, 128>}, {pipeline_mode = #tpu.pipeline_mode<synchronous>, transform_indices = @transform_6, window_bounds = array<i64: 1, 128>}, {transform_indices = @transform_7, window_bounds = array<i64: 16, 128>}]} {
    %c0 = arith.constant 0 : index
    %c0_0 = arith.constant 0 : index
    %0 = vector.load %arg1[%c0, %c0_0] : memref<16x32xbf16, #tpu.memory_space<vmem>>, vector<16x32xbf16>
    %c0_1 = arith.constant 0 : index
    %c0_2 = arith.constant 0 : index
    %1 = vector.load %arg2[%c0_1, %c0_2] : memref<32x128xbf16, #tpu.memory_space<vmem>>, vector<32x128xbf16>
    %cst = arith.constant dense<0.000000e+00> : vector<16x128xf32>
    %2 = tpu.matmul %0, %1, %cst {dimension_numbers = #tpu.dot_dimension_numbers<[1], [0], [0], [1], [0, 0, 1, 1], [], []>} : vector<16x32xbf16>, vector<32x128xbf16>, vector<16x128xf32> -> vector<16x128xf32>
    %c0_3 = arith.constant 0 : index
    %c0_4 = arith.constant 0 : index
    %3 = vector.load %arg3[%c0_3, %c0_4] : memref<1x128xf32, #tpu.memory_space<vmem>>, vector<1x128xf32>
    %4 = vector.broadcast %3 : vector<1x128xf32> to vector<16x128xf32>
    %5 = arith.addf %2, %4 : vector<16x128xf32>
    %cst_5 = arith.constant 0.000000e+00 : f32
    %6 = vector.broadcast %cst_5 : f32 to vector<16x128xf32>
    %7 = arith.maximumf %5, %6 : vector<16x128xf32>
    %8 = arith.truncf %7 : vector<16x128xf32> to vector<16x128xbf16>
    %c0_6 = arith.constant 0 : index
    %c0_7 = arith.constant 0 : index
    %9 = vector.load %arg4[%c0_6, %c0_7] : memref<128x128xbf16, #tpu.memory_space<vmem>>, vector<128x128xbf16>
    %cst_8 = arith.constant dense<0.000000e+00> : vector<16x128xf32>
    %10 = tpu.matmul %8, %9, %cst_8 {dimension_numbers = #tpu.dot_dimension_numbers<[1], [0], [0], [1], [0, 0, 1, 1], [], []>} : vector<16x128xbf16>, vector<128x128xbf16>, vector<16x128xf32> -> vector<16x128xf32>
    %c0_9 = arith.constant 0 : index
    %c0_10 = arith.constant 0 : index
    %11 = vector.load %arg5[%c0_9, %c0_10] : memref<1x128xf32, #tpu.memory_space<vmem>>, vector<1x128xf32>
    %12 = vector.broadcast %11 : vector<1x128xf32> to vector<16x128xf32>
    %13 = arith.addf %10, %12 : vector<16x128xf32>
    %cst_11 = arith.constant 0.000000e+00 : f32
    %14 = vector.broadcast %cst_11 : f32 to vector<16x128xf32>
    %15 = arith.maximumf %13, %14 : vector<16x128xf32>
    %16 = arith.truncf %15 : vector<16x128xf32> to vector<16x128xbf16>
    %c0_12 = arith.constant 0 : index
    %c0_13 = arith.constant 0 : index
    %17 = vector.load %arg6[%c0_12, %c0_13] : memref<128x128xbf16, #tpu.memory_space<vmem>>, vector<128x128xbf16>
    %cst_14 = arith.constant dense<0.000000e+00> : vector<16x128xf32>
    %18 = tpu.matmul %16, %17, %cst_14 {dimension_numbers = #tpu.dot_dimension_numbers<[1], [0], [0], [1], [0, 0, 1, 1], [], []>} : vector<16x128xbf16>, vector<128x128xbf16>, vector<16x128xf32> -> vector<16x128xf32>
    %c0_15 = arith.constant 0 : index
    %c0_16 = arith.constant 0 : index
    %19 = vector.load %arg7[%c0_15, %c0_16] : memref<1x128xf32, #tpu.memory_space<vmem>>, vector<1x128xf32>
    %20 = vector.broadcast %19 : vector<1x128xf32> to vector<16x128xf32>
    %21 = arith.addf %18, %20 : vector<16x128xf32>
    %c0_17 = arith.constant 0 : index
    %c0_18 = arith.constant 0 : index
    %22 = vector.load %arg8[%c0_17, %c0_18] : memref<16x128xf32, #tpu.memory_space<vmem>>, vector<16x128xf32>
    tpu.vector_store %arg8[%c0_17, %c0_18], %21 {strides = array<i32>} : memref<16x128xf32, #tpu.memory_space<vmem>>, vector<16x128xf32>,
    return
  }
  func.func @transform_0(%arg0: i32) -> (i32, i32) {
    %c0_i32 = arith.constant 0 : i32
    %c0_i32_0 = arith.constant 0 : i32
    return %arg0, %c0_i32 : i32, i32
  }
  func.func @transform_1(%arg0: i32) -> (i32, i32) {
    %c0_i32 = arith.constant 0 : i32
    %c0_i32_0 = arith.constant 0 : i32
    %c0_i32_1 = arith.constant 0 : i32
    return %c0_i32, %c0_i32_0 : i32, i32
  }
  func.func @transform_2(%arg0: i32) -> (i32, i32) {
    %c0_i32 = arith.constant 0 : i32
    %c0_i32_0 = arith.constant 0 : i32
    %c0_i32_1 = arith.constant 0 : i32
    return %c0_i32, %c0_i32_0 : i32, i32
  }
  func.func @transform_3(%arg0: i32) -> (i32, i32) {
    %c0_i32 = arith.constant 0 : i32
    %c0_i32_0 = arith.constant 0 : i32
    %c0_i32_1 = arith.constant 0 : i32
    return %c0_i32, %c0_i32_0 : i32, i32
  }
  func.func @transform_4(%arg0: i32) -> (i32, i32) {
    %c0_i32 = arith.constant 0 : i32
    %c0_i32_0 = arith.constant 0 : i32
    %c0_i32_1 = arith.constant 0 : i32
    return %c0_i32, %c0_i32_0 : i32, i32
  }
  func.func @transform_5(%arg0: i32) -> (i32, i32) {
    %c0_i32 = arith.constant 0 : i32
    %c0_i32_0 = arith.constant 0 : i32
    %c0_i32_1 = arith.constant 0 : i32
    return %c0_i32, %c0_i32_0 : i32, i32
  }
  func.func @transform_6(%arg0: i32) -> (i32, i32) {
    %c0_i32 = arith.constant 0 : i32
    %c0_i32_0 = arith.constant 0 : i32
    %c0_i32_1 = arith.constant 0 : i32
    return %c0_i32, %c0_i32_0 : i32, i32
  }
  func.func @transform_7(%arg0: i32) -> (i32, i32) {
    %c0_i32 = arith.constant 0 : i32
    %c0_i32_0 = arith.constant 0 : i32
    return %arg0, %c0_i32 : i32, i32
  }
}

</mosaic_0001>

<bundles_post_ra>
// kernel: tpu_custom_call.1
= control target key start
LH: loop header
LB: loop body
LE: loop exit
PB: predicated region body
PF: predicated region fallthrough
CT: control target
= control target key end

     0   :  { %12 = vsyncpa [#allocation3], 0  ;;  %s638_s0 = inlined_call_operand.hbm [shape: bf16[16,32], index: 0, kind: input, shape index: {}]   ;;  %s639_s1 = inlined_call_operand.hbm [shape: bf16[32,128], index: 1, kind: input, shape index: {}]   ;;  %s640_s2 = inlined_call_operand.vmem [shape: f32[1,128], index: 2, kind: input, shape index: {}]   ;;  %s641_s3 = inlined_call_operand.hbm [shape: bf16[128,128], index: 3, kind: input, shape index: {}]   ;;  %s642_s4 = inlined_call_operand.vmem [shape: f32[1,128], index: 4, kind: input, shape index: {}]   ;;  %s643_s5 = inlined_call_operand.hbm [shape: bf16[128,128], index: 5, kind: input, shape index: {}]   ;;  %s644_s6 = inlined_call_operand.vmem [shape: f32[1,128], index: 6, kind: input, shape index: {}]   ;;  %s645_s7 = inlined_call_operand.hbm [shape: f32[16,128], index: 7, kind: output, shape index: {}]  }
   0x1   :  { %13 = vsyncpa [#allocation6], 0 }
   0x2   :  { %14 = vsyncpa [#allocation9], 0 }
   0x3   :  { %15 = vsyncpa [#allocation4], 0  ;;  %s33_s26 = sshll.u32 %s639_s1, 4  ;;  %s565_s27 = smov [#allocation5]   ;;  %s34_s26 = int_to_ptr.hbm [resolvable:$true] %s33_s26 }
   0x4   :  { %s35_s28 = sshll.u32 %s565_s27, 4  ;;  %s20_s8 = sshll.u32 %s638_s0, 4  ;;  %s36_s28 = int_to_ptr.vmem [resolvable:$true] %s35_s28  ;;  %s21_s8 = int_to_ptr.hbm [resolvable:$true] %s20_s8 }
   0x5   :  { %s566_s9 = smov 64   ;;  %s567_s10 = smov 4  }
   0x6   :  { %41 = dma.hbm_to_vmem [thread:$0]  %s34_s26, 256, %s36_s28, [#allocation6], %s566_s9, %s566_s9, %s567_s10  }
   0x7   :  { %s568_s11 = smov [#allocation2]   ;;  %s48_s15 = sshll.u32 %s641_s3, 4  ;;  %s49_s15 = int_to_ptr.hbm [resolvable:$true] %s48_s15 }
   0x8   :  { %s22_s12 = sshll.u32 %s568_s11, 4  ;;  %s63_s17 = sshll.u32 %s643_s5, 4  ;;  %s23_s12 = int_to_ptr.vmem [resolvable:$true] %s22_s12  ;;  %s64_s17 = int_to_ptr.hbm [resolvable:$true] %s63_s17 }
   0x9   :  { %28 = dma.hbm_to_vmem [thread:$0]  %s21_s8, 128, %s23_s12, [#allocation3], %s566_s9, %s566_s9, %s567_s10  }
   0xa   :  { %s569_s18 = smov [#allocation7]   ;;  %s570_s0 = smov [#allocation8]  }
   0xb   :  { %s50_s19 = sshll.u32 %s569_s18, 4  ;;  %s65_s20 = sshll.u32 %s570_s0, 4  ;;  %s51_s19 = int_to_ptr.vmem [resolvable:$true] %s50_s19  ;;  %s66_s20 = int_to_ptr.vmem [resolvable:$true] %s65_s20 }
   0xc   :  { %56 = dma.hbm_to_vmem [thread:$0]  %s49_s15, 1024, %s51_s19, [#allocation6], %s566_s9, %s566_s9, %s567_s10  }
   0xd   :  { %71 = dma.hbm_to_vmem [thread:$0]  %s64_s17, 1024, %s66_s20, [#allocation9], %s566_s9, %s566_s9, %s567_s10  }
   0xe   :  { %557 = dma.done.wait [#allocation3], 128  }
   0xf   :  { %558 = vsyncadd [#allocation3], 4294967168 }
  0x10   :  { %559 = dma.done.wait [#allocation6], 1280  }
  0x11   :  { %560 = vsyncadd [#allocation6], 4294966016 }
  0x12   :  { %561 = dma.done.wait [#allocation9], 1024  }
  0x13   :  { %562 = vsyncadd [#allocation9], 4294966272  ;;  %v408_v0 = vld [vmem:[#allocation5 + $0x8] sm:$0xff]  ;;  %v407_v2 = vld [vmem:[#allocation5] sm:$0xff]  ;;  %vm118_vm0 = vcmask 261120   ;;  %s571_s24 = smov [#allocation10]  }
  0x14   :  { %v416_v1 = vld [vmem:[#allocation7 + $0x38] sm:$0xff]  ;;  %128 = vmatpush.bf16.msra.mxu0 %v408_v0  ;;  %v415_v3 = vld [vmem:[#allocation7 + $0x30] sm:$0xff]  ;;  %v406_v4 = vld [vmem:[#allocation2] sm:$0xff]  ;;  %s312_s25 = sshll.u32 %s571_s24, 4  ;;  %s572_s28 = smov 128   ;;  %s313_s25 = int_to_ptr.vmem [resolvable:$true] %s312_s25 }
  0x15   :  { %207 = vmatpush.bf16.msra.mxu1 %v416_v1  ;;  %v414_v5 = vld [vmem:[#allocation7 + $0x28] sm:$0xff]  ;;  %v413_v6 = vld [vmem:[#allocation7 + $0x20] sm:$0xff]  ;;  %v412_v7 = vld [vmem:[#allocation7 + $0x18] sm:$0xff]  ;;  %s573_s29 = smov 8  }
  0x16   :  { %v411_v8 = vld [vmem:[#allocation7 + $0x10] sm:$0xff]  ;;  %v410_v9 = vld [vmem:[#allocation7 + $0x8] sm:$0xff]  ;;  %v409_v10 = vld [vmem:[#allocation7] sm:$0xff] }
  0x17   :  { %v424_v11 = vld [vmem:[#allocation8 + $0x38] sm:$0xff]  ;;  %v423_v12 = vld [vmem:[#allocation8 + $0x30] sm:$0xff]  ;;  %v422_v13 = vld [vmem:[#allocation8 + $0x28] sm:$0xff] }
  0x18   :  { %129 = vmatpush.bf16.msra.mxu0 %v407_v2  ;;  %292 = vmatpush.bf16.msra.mxu2 %v424_v11  ;;  %v421_v14 = vld [vmem:[#allocation8 + $0x20] sm:$0xff]  ;;  %v434_v16 = vld [vmem:[%s640_s2] ss:$0 sm:$0xff]  ;;  %v420_v23 = vld [vmem:[#allocation8 + $0x18] sm:$0xff] }
  0x19   :  { %208 = vmatpush.bf16.msra.mxu1 %v415_v3  ;;  %v419_v24 = vld [vmem:[#allocation8 + $0x10] sm:$0xff]  ;;  %v418_v25 = vld [vmem:[#allocation8 + $0x8] sm:$0xff]  ;;  %v417_v26 = vld [vmem:[#allocation8] sm:$0xff] }
  0x1a   :  { %v435_v28 = vld [vmem:[%s642_s4] ss:$0 sm:$0xff]  ;;  %s314_s4 = sshll.u32 %s645_s7, 4  ;;  %s315_s4 = int_to_ptr.hbm [resolvable:$true] %s314_s4 }
  0x1b   :  { %341 = vmatmul.msk.bf16.vlgmr.msra.gmra.mxu0 %vm118_vm0, %v406_v4  ;;  %v436_v35 = vld [vmem:[%s644_s6] ss:$0 sm:$0xff] }
  0x1c   :  { %293 = vmatpush.bf16.msra.mxu2 %v423_v12 }
  0x1d   :  { %209 = vmatpush.bf16.msra.mxu1 %v414_v5 }
  0x20   :  { %294 = vmatpush.bf16.msra.mxu2 %v422_v13 }
  0x21   :  { %210 = vmatpush.bf16.msra.mxu1 %v413_v6 }
  0x24   :  { %295 = vmatpush.bf16.msra.mxu2 %v421_v14 }
  0x25   :  { %211 = vmatpush.bf16.msra.mxu1 %v412_v7 }
  0x28   :  { %296 = vmatpush.bf16.msra.mxu2 %v420_v23 }
  0x29   :  { %212 = vmatpush.bf16.msra.mxu1 %v411_v8 }
  0x2c   :  { %297 = vmatpush.bf16.msra.mxu2 %v419_v24 }
  0x2d   :  { %213 = vmatpush.bf16.msra.mxu1 %v410_v9 }
  0x30   :  { %298 = vmatpush.bf16.msra.mxu2 %v418_v25 }
  0x31   :  { %214 = vmatpush.bf16.msra.mxu1 %v409_v10 }
  0x34   :  { %299 = vmatpush.bf16.msra.mxu2 %v417_v26 }
  0x98   :  { %v131_v15 = vpop.f32.mrf.mxu0 }
  0x99   :  { %v132_v17 = vadd.f32 %v434_v16, %v131_v15 }
  0x9b   :  { %v136_v20 = vmax.f32 %v132_v17, 0.0 }
  0xa0   :  { %v133_v18 = vpop.f32.mrf.mxu0 }
  0xa1   :  { %v134_v19 = vadd.f32 %v434_v16, %v133_v18 }
  0xa3   :  { %v137_v21 = vmax.f32 %v134_v19, 0.0 }
  0xa5   :  { %v138_v22 = vpack.c.bf16 %v137_v21, %v136_v20 }
  0xa7   :  { %215 = vmatmul.bf16.vlgmr.msra.gmra.mxu1 %v138_v22 }
 0x124   :  { %v216_v27 = vpop.f32.mrf.mxu1 }
 0x125   :  { %v217_v29 = vadd.f32 %v435_v28, %v216_v27 }
 0x127   :  { %v221_v32 = vmax.f32 %v217_v29, 0.0 }
 0x12c   :  { %v218_v30 = vpop.f32.mrf.mxu1 }
 0x12d   :  { %v219_v31 = vadd.f32 %v435_v28, %v218_v30 }
 0x12f   :  { %v222_v33 = vmax.f32 %v219_v31, 0.0 }
 0x131   :  { %v223_v34 = vpack.c.bf16 %v222_v33, %v221_v32 }
 0x133   :  { %300 = vmatmul.bf16.vlgmr.msra.gmra.mxu2 %v223_v34 }
 0x1b6   :  { %v301_v36 = vpop.f32.mrf.mxu2 }
 0x1b7   :  { %v302_v37 = vadd.f32 %v436_v35, %v301_v36 }
 0x1b9   :  { %306 = vst [vmem:[#allocation10] sm:$0xff] %v302_v37 }
 0x1be   :  { %v303_v38 = vpop.f32.mrf.mxu2 }
 0x1bf   :  { %v304_v39 = vadd.f32 %v436_v35, %v303_v38 }
 0x1c1   :  { %307 = vst [vmem:[#allocation10 + $0x8] sm:$0xff] %v304_v39 }
 0x1c2   :  { %320 = dma.vmem_to_hbm [thread:$0]  %s313_s25, 256, %s315_s4, [#allocation4], %s572_s28, %s572_s28, %s573_s29  }
 0x1c3   :  { %563 = dma.done.wait [#allocation4], 256  }
 0x1c4   :  { %564 = vsyncadd [#allocation4], 4294967040 }
 0x1c5   :  { %325 = vsyncpa [#allocation3], 1 }
 0x1c6   :  { %326 = vsyncpa [#allocation6], 1 }
 0x1c7   :  { %327 = vsyncpa [#allocation9], 1 }
 0x1c8   :  { %328 = vsyncpa [#allocation4], 1 }

</bundles_post_ra>
